<compile_context>
chip_gen: v6e
topology: v6e:2x2x1
jax: 0.10.0
libtpu: 0.0.40
codegen_flags: <defaults>
</compile_context>

<pallas_src>
import math
import jax
import jax.numpy as jnp
from jax import lax
from jax.experimental import pallas as pl
from jax.experimental.pallas import tpu as pltpu


def _round_up(x, m):
    return ((x + m - 1) // m) * m


def _lora_kernel(x_ref, w_ref, m_ref, A_ref, B_ref, o_ref):
    x = x_ref[...]                                        # (tm, in_f) bf16

    # Base linear x @ W^T: contract x dim 1 with weight dim 1 (weight block is
    # [tn, in_f]); Mosaic feeds the transposed operand to the MXU natively.
    acc = lax.dot_general(
        x, w_ref[...],
        dimension_numbers=(((1,), (1,)), ((), ())),
        preferred_element_type=jnp.float32)               # (tm, tn) f32

    # Fused LoRA path: one (tm,in_f)@(in_f,3r) push, per-token gates applied
    # in bf16 to the small (tm,3r) intermediate (m*(x@A) == (x*m)@A for
    # per-row scalar gates), then one (tm,3r)@(3r,tn) push.  scale=2 is
    # already folded into B_cat by the wrapper.
    t = jnp.dot(x, A_ref[...], preferred_element_type=jnp.float32)
    t = t.astype(x.dtype) * m_ref[...]                    # (tm, 3r) bf16
    acc = acc + jnp.dot(t, B_ref[...], preferred_element_type=jnp.float32)

    o_ref[...] = acc.astype(o_ref.dtype)


def triple_linear_lora_forward(x, masks, weight,
                               lora_A_cl, lora_B_cl,
                               lora_A_lm, lora_B_lm,
                               lora_A_cl_prime, lora_B_cl_prime,
                               *, tm=256, tn=256):
    """x: [B, S, in_features]; masks: dict that may contain 'cl_mask',
    'lm_mask', 'cl_prime_mask' (each [B, S, 1]); weight: [out_f, in_f]
    (PyTorch F.linear convention, NOT transposed)."""
    B, S, in_f = x.shape
    out_f = weight.shape[0]
    dt = x.dtype
    M = B * S

    r_cl = lora_A_cl.shape[1]
    r_lm = lora_A_lm.shape[1]
    r_cp = lora_A_cl_prime.shape[1]
    r3 = r_cl + r_lm + r_cp
    scale = 2.0  # module hard-codes self.scale = 2

    # -- fold the three LoRA factor pairs into one; fold scale into B_cat ----
    A_cat = jnp.concatenate([lora_A_cl, lora_A_lm, lora_A_cl_prime], axis=1)
    B_cat = (jnp.concatenate([lora_B_cl, lora_B_lm, lora_B_cl_prime], axis=0)
             .astype(jnp.float32) * jnp.float32(scale)).astype(dt)

    # -- per-token gates expanded to the (M, 3r) intermediate width ----------
    def _gate(name, r):
        m = masks.get(name)
        if m is None:  # missing key == branch skipped == zero contribution
            return jnp.zeros((M, r), dt)
        return jnp.broadcast_to(m.reshape(M, 1).astype(dt), (M, r))

    m_cat = jnp.concatenate([_gate("cl_mask", r_cl),
                             _gate("lm_mask", r_lm),
                             _gate("cl_prime_mask", r_cp)], axis=1)   # (M, 3r)

    x2 = x.reshape(M, in_f)

    # -- tiling / padding -----------------------------------------------------
    tm = min(tm, _round_up(M, 16))          # bf16 packs 16 rows per vreg
    M_pad = _round_up(M, tm)
    if M_pad != M:
        x2 = jnp.pad(x2, ((0, M_pad - M), (0, 0)))
        m_cat = jnp.pad(m_cat, ((0, M_pad - M), (0, 0)))

    tn = min(tn, out_f)
    if out_f % tn != 0 or tn % 128 != 0:
        tn = out_f                           # fall back to a full-width block

    grid = (M_pad // tm, out_f // tn)

    flops = 2 * M_pad * (in_f * out_f + in_f * r3 + r3 * out_f)
    bytes_accessed = 2 * (M_pad * in_f + out_f * in_f + M_pad * r3 +
                          in_f * r3 + r3 * out_f + M_pad * out_f)
    cost = pl.CostEstimate(flops=flops, transcendentals=0,
                           bytes_accessed=bytes_accessed)

    out = pl.pallas_call(
        _lora_kernel,
        out_shape=jax.ShapeDtypeStruct((M_pad, out_f), dt),
        grid_spec=pltpu.PrefetchScalarGridSpec(
            num_scalar_prefetch=0,
            grid=grid,
            in_specs=[
                pl.BlockSpec((tm, in_f), lambda i, j: (i, 0)),   # x rows
                pl.BlockSpec((tn, in_f), lambda i, j: (j, 0)),   # weight rows
                pl.BlockSpec((tm, r3),   lambda i, j: (i, 0)),   # gates
                pl.BlockSpec((in_f, r3), lambda i, j: (0, 0)),   # A_cat
                pl.BlockSpec((r3, tn),   lambda i, j: (0, j)),   # B_cat
            ],
            out_specs=pl.BlockSpec((tm, tn), lambda i, j: (i, j)),
        ),
        compiler_params=pltpu.CompilerParams(
            dimension_semantics=("parallel", "parallel"),
            vmem_limit_bytes=64 * 1024 * 1024),
        cost_estimate=cost,
    )(x2, weight, m_cat, A_cat, B_cat)
    # TODO(synk): for very large in_f, add a K grid axis ("arbitrary") with an
    # fp32 VMEM accumulator; not needed at typical LoRA layer sizes.

    return out[:M].reshape(B, S, out_f)


def _kaiming_uniform(key, shape, dtype):
    # nn.init.kaiming_uniform_(w, a=sqrt(5)) on a 2-D tensor:
    # fan_in = shape[1], bound = 1/sqrt(fan_in)
    fan_in = shape[1]
    bound = 1.0 / math.sqrt(fan_in)
    return jax.random.uniform(key, shape, jnp.float32, -bound, bound).astype(dtype)


if __name__ == "__main__":
    key = jax.random.PRNGKey(0)
    ks = jax.random.split(key, 12)

    Bsz, S, in_f, out_f, r = 4, 128, 256, 256, 16
    dt = jnp.bfloat16

    # Frozen base weight (passed into the module in PyTorch).
    weight = jax.random.normal(ks[0], (out_f, in_f), jnp.float32).astype(dt) * 0.05

    # LoRA A: kaiming-uniform (as in __init__).  LoRA B: __init__ zeros them,
    # but we use small nonzero values here so the LoRA path is exercised.
    lora_A_cl = _kaiming_uniform(ks[1], (in_f, r), dt)
    lora_B_cl = jax.random.normal(ks[2], (r, out_f), jnp.float32).astype(dt) * 0.02
    lora_A_lm = _kaiming_uniform(ks[3], (in_f, r), dt)
    lora_B_lm = jax.random.normal(ks[4], (r, out_f), jnp.float32).astype(dt) * 0.02
    lora_A_cp = _kaiming_uniform(ks[5], (in_f, r), dt)
    lora_B_cp = jax.random.normal(ks[6], (r, out_f), jnp.float32).astype(dt) * 0.02

    x = jax.random.normal(ks[7], (Bsz, S, in_f), jnp.float32).astype(dt)
    masks = {
        "cl_mask":       (jax.random.uniform(ks[8],  (Bsz, S, 1)) > 0.5).astype(dt),
        "lm_mask":       (jax.random.uniform(ks[9],  (Bsz, S, 1)) > 0.5).astype(dt),
        "cl_prime_mask": (jax.random.uniform(ks[10], (Bsz, S, 1)) > 0.5).astype(dt),
    }

    out = triple_linear_lora_forward(
        x, masks, weight,
        lora_A_cl, lora_B_cl, lora_A_lm, lora_B_lm, lora_A_cp, lora_B_cp)
    jax.block_until_ready(out)

    # Pure-JAX reference check (same semantics as the PyTorch forward).
    def ref(x, masks):
        res = jnp.einsum("bsi,oi->bso", x.astype(jnp.float32),
                         weight.astype(jnp.float32))
        for m, A, B in ((masks["cl_mask"], lora_A_cl, lora_B_cl),
                        (masks["lm_mask"], lora_A_lm, lora_B_lm),
                        (masks["cl_prime_mask"], lora_A_cp, lora_B_cp)):
            xm = x.astype(jnp.float32) * m.astype(jnp.float32)
            res = res + 2.0 * (xm @ A.astype(jnp.float32) @ B.astype(jnp.float32))
        return res

    r_f32 = ref(x, masks)
    assert out.shape == (Bsz, S, out_f)
    assert jnp.allclose(out.astype(jnp.float32), r_f32, atol=5e-2, rtol=5e-2)

    print("KERNEL_OK")
</pallas_src>

<mosaic_0001>
module attributes {stable_mosaic.version = 11 : i64} {
  func.func @_lora_kernel(%arg0: i32, %arg1: i32, %arg2: memref<256x256xbf16, #tpu.memory_space<vmem>>, %arg3: memref<256x256xbf16, #tpu.memory_space<vmem>>, %arg4: memref<256x48xbf16, #tpu.memory_space<vmem>>, %arg5: memref<256x48xbf16, #tpu.memory_space<vmem>>, %arg6: memref<48x256xbf16, #tpu.memory_space<vmem>>, %arg7: memref<256x256xbf16, #tpu.memory_space<vmem>>) attributes {dimension_semantics = [#tpu.dimension_semantics<parallel>, #tpu.dimension_semantics<parallel>], iteration_bounds = array<i64: 2, 1>, scalar_prefetch = 0 : i64, scratch_operands = 0 : i64, tpu.core_type = #tpu.core_type<tc>, window_params = [{transform_indices = @transform_0, window_bounds = array<i64: 256, 256>}, {transform_indices = @transform_1, window_bounds = array<i64: 256, 256>}, {transform_indices = @transform_2, window_bounds = array<i64: 256, 48>}, {pipeline_mode = #tpu.pipeline_mode<synchronous>, transform_indices = @transform_3, window_bounds = array<i64: 256, 48>}, {transform_indices = @transform_4, window_bounds = array<i64: 48, 256>}, {transform_indices = @transform_5, window_bounds = array<i64: 256, 256>}]} {
    %c0 = arith.constant 0 : index
    %c0_0 = arith.constant 0 : index
    %0 = vector.load %arg2[%c0, %c0_0] : memref<256x256xbf16, #tpu.memory_space<vmem>>, vector<256x256xbf16>
    %c0_1 = arith.constant 0 : index
    %c0_2 = arith.constant 0 : index
    %1 = vector.load %arg3[%c0_1, %c0_2] : memref<256x256xbf16, #tpu.memory_space<vmem>>, vector<256x256xbf16>
    %cst = arith.constant dense<0.000000e+00> : vector<256x256xf32>
    %2 = tpu.matmul %0, %1, %cst {dimension_numbers = #tpu.dot_dimension_numbers<[1], [1], [0], [0], [0, 0, 1, 0], [], []>} : vector<256x256xbf16>, vector<256x256xbf16>, vector<256x256xf32> -> vector<256x256xf32>
    %c0_3 = arith.constant 0 : index
    %c0_4 = arith.constant 0 : index
    %3 = vector.load %arg5[%c0_3, %c0_4] : memref<256x48xbf16, #tpu.memory_space<vmem>>, vector<256x48xbf16>
    %cst_5 = arith.constant dense<0.000000e+00> : vector<256x48xf32>
    %4 = tpu.matmul %0, %3, %cst_5 {dimension_numbers = #tpu.dot_dimension_numbers<[1], [0], [0], [1], [0, 0, 1, 1], [], []>} : vector<256x256xbf16>, vector<256x48xbf16>, vector<256x48xf32> -> vector<256x48xf32>
    %5 = arith.truncf %4 : vector<256x48xf32> to vector<256x48xbf16>
    %c0_6 = arith.constant 0 : index
    %c0_7 = arith.constant 0 : index
    %6 = vector.load %arg4[%c0_6, %c0_7] : memref<256x48xbf16, #tpu.memory_space<vmem>>, vector<256x48xbf16>
    %7 = arith.mulf %5, %6 : vector<256x48xbf16>
    %c0_8 = arith.constant 0 : index
    %c0_9 = arith.constant 0 : index
    %8 = vector.load %arg6[%c0_8, %c0_9] : memref<48x256xbf16, #tpu.memory_space<vmem>>, vector<48x256xbf16>
    %cst_10 = arith.constant dense<0.000000e+00> : vector<256x256xf32>
    %9 = tpu.matmul %7, %8, %cst_10 {dimension_numbers = #tpu.dot_dimension_numbers<[1], [0], [0], [1], [0, 0, 1, 1], [], []>} : vector<256x48xbf16>, vector<48x256xbf16>, vector<256x256xf32> -> vector<256x256xf32>
    %10 = arith.addf %2, %9 : vector<256x256xf32>
    %11 = arith.truncf %10 : vector<256x256xf32> to vector<256x256xbf16>
    %c0_11 = arith.constant 0 : index
    %c0_12 = arith.constant 0 : index
    %12 = vector.load %arg7[%c0_11, %c0_12] : memref<256x256xbf16, #tpu.memory_space<vmem>>, vector<256x256xbf16>
    tpu.vector_store %arg7[%c0_11, %c0_12], %11 {strides = array<i32>} : memref<256x256xbf16, #tpu.memory_space<vmem>>, vector<256x256xbf16>,
    return
  }
  func.func @transform_0(%arg0: i32, %arg1: i32) -> (i32, i32) {
    %c0_i32 = arith.constant 0 : i32
    %c0_i32_0 = arith.constant 0 : i32
    return %arg0, %c0_i32 : i32, i32
  }
  func.func @transform_1(%arg0: i32, %arg1: i32) -> (i32, i32) {
    %c0_i32 = arith.constant 0 : i32
    %c0_i32_0 = arith.constant 0 : i32
    return %arg1, %c0_i32 : i32, i32
  }
  func.func @transform_2(%arg0: i32, %arg1: i32) -> (i32, i32) {
    %c0_i32 = arith.constant 0 : i32
    %c0_i32_0 = arith.constant 0 : i32
    return %arg0, %c0_i32 : i32, i32
  }
  func.func @transform_3(%arg0: i32, %arg1: i32) -> (i32, i32) {
    %c0_i32 = arith.constant 0 : i32
    %c0_i32_0 = arith.constant 0 : i32
    %c0_i32_1 = arith.constant 0 : i32
    return %c0_i32, %c0_i32_0 : i32, i32
  }
  func.func @transform_4(%arg0: i32, %arg1: i32) -> (i32, i32) {
    %c0_i32 = arith.constant 0 : i32
    %c0_i32_0 = arith.constant 0 : i32
    return %c0_i32, %arg1 : i32, i32
  }
  func.func @transform_5(%arg0: i32, %arg1: i32) -> (i32, i32) {
    %c0_i32 = arith.constant 0 : i32
    return %arg0, %arg1 : i32, i32
  }
}

</mosaic_0001>

<bundles_post_ra>
// kernel: tpu_custom_call.1
= control target key start
LH: loop header
LB: loop body
LE: loop exit
PB: predicated region body
PF: predicated region fallthrough
CT: control target
= control target key end

     0   :  { %10 = vsyncpa [#allocation3], 0  ;;  %s3391_s0 = inlined_call_operand.vmem [shape: bf16[512,256], index: 0, kind: input, shape index: {}]   ;;  %s3392_s1 = inlined_call_operand.hbm [shape: bf16[256,256], index: 1, kind: input, shape index: {}]   ;;  %s3393_s2 = inlined_call_operand.vmem [shape: bf16[512,48], index: 2, kind: input, shape index: {}]   ;;  %s3394_s3 = inlined_call_operand.vmem [shape: bf16[256,48], index: 3, kind: input, shape index: {}]   ;;  %s3395_s4 = inlined_call_operand.hbm [shape: bf16[48,256], index: 4, kind: input, shape index: {}]   ;;  %s3396_s5 = inlined_call_operand.hbm [shape: bf16[512,256], index: 5, kind: output, shape index: {}]  }
   0x1   :  { %11 = vsyncpa [#allocation6], 0 }
   0x2   :  { %12 = vsyncpa [#allocation4], 0 }
   0x3   :  { %14 = vsyncpa [#allocation4 + $0x1], 0  ;;  %s2716_s18 = smov 0   ;;  %s2718_s19 = smov 0  }
   0x4   :  { %s2720_s20 = smov 0   ;;  %s2722_s21 = smov 0  }
   0x5   :  { %s2724_s22 = smov 0   ;;  %s2726_s23 = smov 0  }
   0x6 LB: > { %s1972_s24 = sadd.s32 4294967295, %s2676_s23   ;;  %s1973_s25 = sadd.s32 4294967294, %s2676_s23   ;;  %s2676_s23 = sphi %s2726_s23, %s20_s23   ;;  %s2672_s22 = sphi %s2724_s22, %s3424_s22   ;;  %s2668_s21 = sphi %s2722_s21, %s3423_s21   ;;  %s2664_s20 = sphi %s2720_s20, %s3422_s20   ;;  %s2660_s19 = sphi %s2718_s19, %s3421_s19   ;;  %s2656_s18 = sphi %s2716_s18, %s3420_s18  }
   0x7   : > { %s32_s26 = sadd.s32 1, %s2672_s22  ;;  %s166_s27 = sadd.s32 1, %s2664_s20 }
   0x8   : > { %p34_p0 = scmp.ge.s32.totalorder %s32_s26, 2  ;;  %p176_p1 = scmp.ne.s32.totalorder %s2664_s20, %s2660_s19 }
   0x9   : > { %p177_p2 = scmp.eq.s32.totalorder %s1972_s24, 1  ;;  %p182_p3 = scmp.ne.s32.totalorder %s2660_s19, %s2656_s18 }
   0xa   : > { %s3426_s26 = smov (%p34_p0, %s32_s26), 0  ;;  %p183_p5 = scmp.eq.s32.totalorder %s1973_s25, 1 }
   0xb   : > { %p2756_p4 = por %p177_p2, %p176_p1  ;;  %s161_s29 = ssub.s32 %s2672_s22, %s3426_s26 }
   0xc   : > { %p1974_p6 = scmp.ge.s32.totalorder %s2676_s23, 1  ;;  %p164_p7 = scmp.eq.s32.totalorder %s161_s29, 0 }
   0xd   : > { %s3404_s28 = scalar_select %p2756_p4, 1, 0 }
   0xe   : > { %p2763_p8 = por %p183_p5, %p182_p3  ;;  %p190_p9 = scmp.lt.s32.totalorder %s2676_s23, 3 }
   0xf   : > { %s2769_s6 = scalar_select %p164_p7, %s2664_s20, %s166_s27  }
  0x10   : > { %s3405_s30 = scalar_select %p2763_p8, 1, 0 }
  0x11   : > { %p2771_p10 = pnand %p1974_p6, %p190_p9  ;;  %p2775_p11 = scmp.eq.s32.totalorder %s1972_s24, 0 }
  0x12   : > { %s2678_s9 = smov [#allocation2]   ;;  %s2679_s12 = smov [#allocation5]  }
  0x13   : > { %p2332_p12 = pneg %p2771_p10  ;;  %s206_s10 = sshll.u32 %s2678_s9, 4  ;;  %s207_s10 = int_to_ptr.vmem [resolvable:$true] %s206_s10 }
  0x14   : > { %s225_s13 = sshll.u32 %s2679_s12, 4  ;;  %s2551_s14 = scalar_lea.vmem %s207_s10, 4096  ;;  %s226_s13 = int_to_ptr.vmem [resolvable:$true] %s225_s13 }
  0x15   : > { %p2783_p13 = pnand %p2775_p11, %p2332_p12  ;;  %p2552_p1 = scmp.ne.s32.totalorder %s207_s10, %s2551_s14 }
  0x16   : > { %p2559_p5 = scmp.lt.s32.totalorder %s207_s10, %s207_s10  ;;  %p2560_p6 = scmp.lt.s32.totalorder %s2551_s14, %s2551_s14 }
  0x17   : > { %p2542_p0 = pneg %p2783_p13 }
  0x18   : > { %p2561_p7 = por %p2560_p6, %p2559_p5 }
  0x19   : > { %p2554_p2 = pnand %p2552_p1, %p2542_p0 }
  0x1b   : > { %p2555_p3 = pneg %p2554_p2 }
  0x1d   : > { %p2562_p9 = pnand %p2561_p7, %p2555_p3 }
  0x1f   : > { %2565 = shalt.err (!%p2562_p9)
}
  0x20   : > { %s2680_s15 = smov 128   ;;  %s2681_s16 = smov 8  }
  0x21   : > { %2335 = dma.hbm_to_vmem [thread:$0]  (!%p2783_p13), %s3392_s1, 4096, %s207_s10, [#allocation3], %s2680_s15, %s2680_s15, %s2681_s16  }
  0x22   : > { %s2577_s25 = scalar_lea.vmem %s226_s13, 768  ;;  %p2585_p8 = scmp.lt.s32.totalorder %s226_s13, %s226_s13 }
  0x23   : > { %p2578_p12 = scmp.ne.s32.totalorder %s226_s13, %s2577_s25  ;;  %p2586_p4 = scmp.lt.s32.totalorder %s2577_s25, %s2577_s25 }
  0x25   : > { %p2580_p1 = pnand %p2578_p12, %p2542_p0  ;;  %p2587_p5 = por %p2586_p4, %p2585_p8 }
  0x27   : > { %p2581_p2 = pneg %p2580_p1 }
  0x29   : > { %p2588_p3 = pnand %p2587_p5, %p2581_p2 }
  0x2b   : > { %2591 = shalt.err (!%p2588_p3)
}
  0x2c   : > { %2338 = dma.hbm_to_vmem [thread:$0]  (!%p2783_p13), %s3395_s4, 768, %s226_s13, [#allocation6], %s2680_s15, %s2680_s15, %s2681_s16  }
  0x2d   : > { %260 = sbr.rel (%p2771_p10) target bundleno = 708 (0x2c4), region = 40 }
  0x32   : > { %2643 = dma.done.wait (%p2775_p11), [#allocation3], 4096  }
  0x33   : > { %2645 = vsyncadd (%p2775_p11), [#allocation3], 4294963200 }
  0x34   : > { %2647 = dma.done.wait (%p2775_p11), [#allocation6], 768  }
  0x35   : > { %2649 = vsyncadd (%p2775_p11), [#allocation6], 4294966528  ;;  %v2403_v0 = vld [vmem:[%s3394_s3 + $0x78] sm:$0xff]   ;;  %s1982_s11 = sshll.u32 %s2668_s21, 5  ;;  %v2405_v2 = vld [vmem:[%s3394_s3 + $0x70] sm:$0xff]   ;;  %vm1025_vm0 = vcmask 392192  }
  0x36   : > { %v2404_v1 = vld [vmem:[%s3394_s3 + $0x38] sm:$0xff]   ;;  %2178 = vmatprep.subr.bf16.mxu0 %v2403_v0  ;;  %v2406_v3 = vld [vmem:[%s3394_s3 + $0x30] sm:$0xff]   ;;  %p299_p4 = scmp.lt.s32.totalorder %s1982_s11, 63  ;;  %v2407_v4 = vld [vmem:[%s3394_s3 + $0x68] sm:$0xff]   ;;  %s2177_s9 = sshll.u32 %s2668_s21, 12 }
  0x37   : > { %2179 = vmatpush3.bf16.msra.mxu0 %v2404_v1  ;;  %v2408_v5 = vld [vmem:[%s3394_s3 + $0x28] sm:$0xff]   ;;  %v2409_v6 = vld [vmem:[%s3394_s3 + $0x60] sm:$0xff]   ;;  %v2411_v8 = vld [vmem:[%s3394_s3 + $0x58] sm:$0xff]   ;;  %v3398_v1 = vmov 0   ;;  %s3339_s13 = scalar_lea.hbm %s3396_s5, %s2177_s9  ;;  %p3418_p10 = scmp.ne.s32.totalorder %s3404_s28, 0 }
  0x38   : > { %2180 = vmatprep.subr.bf16.mxu0 %v2405_v2  ;;  %s3428_s11 = smov (!%p299_p4, %s1982_s11), 63  ;;  %v2410_v7 = vld [vmem:[%s3394_s3 + $0x20] sm:$0xff]   ;;  %v2412_v9 = vld [vmem:[%s3394_s3 + $0x18] sm:$0xff]   ;;  %v2413_v10 = vld [vmem:[%s3394_s3 + $0x50] sm:$0xff]   ;;  %1106 = vmatprep.mubr.bf16.mxu1 %v3398_v1  ;;  %s2683_s15 = smov [#allocation7]  }
  0x39   : > { %s2143_s7 = sshll.u32 %s3428_s11, 3  ;;  %v2414_v12 = vld [vmem:[%s3394_s3 + $0x10] sm:$0xff]   ;;  %v2415_v13 = vld [vmem:[%s3394_s3 + $0x48] sm:$0xff]   ;;  %v2417_v15 = vld [vmem:[%s3394_s3 + $0x40] sm:$0xff]   ;;  %s1986_s17 = sshll.u32 %s3428_s11, 2 }
  0x3a   : > { %s2849_s16 = scalar_lea.vmem %s3391_s0, %s2143_s7  ;;  %v2416_v14 = vld [vmem:[%s3394_s3 + $0x8] sm:$0xff]   ;;  %v2418_v16 = vld [vmem:[%s3394_s3] sm:$0xff]   ;;  %v2879_v18 = vld [vmem:[#allocation2 + $0x74] ss:$8 sps:$4 sm:$0xff]   ;;  %s2935_s27 = scalar_lea.vmem %s3393_s2, %s1986_s17 }
  0x3b   : > { %2181 = vmatpush3.bf16.msra.mxu0 %v2406_v3  ;;  %v2858_v11 = vld [vmem:[%s2849_s16 + $0x4] ss:$8 sps:$4 sm:$0xff]   ;;  %v2877_v17 = vld [vmem:[%s2849_s16] ss:$8 sps:$4 sm:$0xff]   ;;  %v2882_v19 = vld [vmem:[%s2849_s16 + $0x14] ss:$8 sps:$4 sm:$0xff]  }
  0x3c   : > { %2182 = vmatprep.subr.bf16.mxu0 %v2407_v4  ;;  %700 = vmatprep.mubr.bf16.mxu0 %v2858_v11  ;;  %v2884_v20 = vld [vmem:[#allocation2 + $0x70] ss:$8 sps:$4 sm:$0xff]   ;;  %v2887_v21 = vld [vmem:[#allocation2 + $0x64] ss:$8 sps:$4 sm:$0xff]   ;;  %v2899_v24 = vld [vmem:[#allocation2 + $0x60] ss:$8 sps:$4 sm:$0xff]  }
  0x3d   : > { %v2894_v22 = vld [vmem:[%s2849_s16 + $0x10] ss:$8 sps:$4 sm:$0xff]   ;;  %v2897_v23 = vld [vmem:[%s2849_s16 + $0x24] ss:$8 sps:$4 sm:$0xff]   ;;  %v2901_v25 = vld [vmem:[#allocation2 + $0x54] ss:$8 sps:$4 sm:$0xff]  }
  0x3e   : > { %v2908_v26 = vld [vmem:[%s2849_s16 + $0x20] ss:$8 sps:$4 sm:$0xff]   ;;  %v2911_v27 = vld [vmem:[%s2849_s16 + $0x34] ss:$8 sps:$4 sm:$0xff]   ;;  %v2913_v28 = vld [vmem:[#allocation2 + $0x50] ss:$8 sps:$4 sm:$0xff]  }
  0x3f   : > { %2183 = vmatpush3.bf16.msra.mxu0 %v2408_v5  ;;  %v2915_v29 = vld [vmem:[#allocation2 + $0x44] ss:$8 sps:$4 sm:$0xff]   ;;  %v2922_v30 = vld [vmem:[%s2849_s16 + $0x30] ss:$8 sps:$4 sm:$0xff]   ;;  %v2928_v32 = vld [vmem:[#allocation2 + $0x40] ss:$8 sps:$4 sm:$0xff]  }
  0x40   : > { %2184 = vmatprep.subr.bf16.mxu0 %v2409_v6  ;;  %v2926_v31 = vld [vmem:[%s2849_s16 + $0x44] ss:$8 sps:$4 sm:$0xff]   ;;  %v2930_v33 = vld [vmem:[#allocation2 + $0x34] ss:$8 sps:$4 sm:$0xff]   ;;  %v2941_v34 = vld [vmem:[%s2849_s16 + $0x40] ss:$8 sps:$4 sm:$0xff]  }
  0x41   : > { %v2945_v35 = vld [vmem:[%s2849_s16 + $0x54] ss:$8 sps:$4 sm:$0xff]   ;;  %v2947_v36 = vld [vmem:[#allocation2 + $0x30] ss:$8 sps:$4 sm:$0xff]   ;;  %v2949_v37 = vld [vmem:[#allocation2 + $0x24] ss:$8 sps:$4 sm:$0xff]  }
  0x42   : > { %v2956_v38 = vld [vmem:[%s2849_s16 + $0x50] ss:$8 sps:$4 sm:$0xff]   ;;  %v2959_v39 = vld [vmem:[%s2849_s16 + $0x64] ss:$8 sps:$4 sm:$0xff]   ;;  %v2961_v40 = vld [vmem:[#allocation2 + $0x20] ss:$8 sps:$4 sm:$0xff]  }
  0x43   : > { %2185 = vmatpush3.bf16.msra.mxu0 %v2410_v7  ;;  %v2963_v41 = vld [vmem:[#allocation2 + $0x14] ss:$8 sps:$4 sm:$0xff]   ;;  %v2970_v42 = vld [vmem:[%s2849_s16 + $0x60] ss:$8 sps:$4 sm:$0xff]   ;;  %v2975_v44 = vld [vmem:[#allocation2 + $0x10] ss:$8 sps:$4 sm:$0xff]  }
  0x44   : > { %2186 = vmatprep.subr.bf16.mxu0 %v2411_v8  ;;  %v2973_v43 = vld [vmem:[%s2849_s16 + $0x74] ss:$8 sps:$4 sm:$0xff]   ;;  %v2977_v45 = vld [vmem:[#allocation2 + $0x4] ss:$8 sps:$4 sm:$0xff]   ;;  %v2984_v46 = vld [vmem:[%s2849_s16 + $0x70] ss:$8 sps:$4 sm:$0xff]  }
  0x45   : > { %v2987_v47 = vld [vmem:[%s2849_s16 + $0x84] ss:$8 sps:$4 sm:$0xff]   ;;  %v2989_v48 = vld [vmem:[#allocation2] ss:$8 sps:$4 sm:$0xff]   ;;  %v2991_v49 = vld [vmem:[#allocation2 + $0xf4] ss:$8 sps:$4 sm:$0xff]  }
  0x46   : > { %v2998_v50 = vld [vmem:[%s2849_s16 + $0x80] ss:$8 sps:$4 sm:$0xff]   ;;  %v3001_v51 = vld [vmem:[%s2849_s16 + $0x94] ss:$8 sps:$4 sm:$0xff]   ;;  %v3003_v52 = vld [vmem:[#allocation2 + $0xf0] ss:$8 sps:$4 sm:$0xff]  }
  0x47   : > { %2187 = vmatpush3.bf16.msra.mxu0 %v2412_v9  ;;  %v3005_v53 = vld [vmem:[#allocation2 + $0xe4] ss:$8 sps:$4 sm:$0xff]   ;;  %v2514_v55 = vld [vmem:[#allocation5 + $0x20] ss:$8 sps:$4 sm:$0xff]   ;;  %v2515_v56 = vld [vmem:[#allocation5 + $0x14] ss:$8 sps:$4 sm:$0xff]  }
  0x48   : > { %2188 = vmatprep.subr.bf16.mxu0 %v2413_v10  ;;  %v2512_v54 = vld [vmem:[#allocation5 + $0x24] ss:$8 sps:$4 sm:$0xff]   ;;  %v3012_v57 = vld [vmem:[%s2849_s16 + $0x90] ss:$8 sps:$4 sm:$0xff]   ;;  %v3017_v60 = vld [vmem:[#allocation2 + $0xe0] ss:$8 sps:$4 sm:$0xff]  }
  0x49   : > { %1084 = vmatprep.subr.bf16.mxu1 %v2512_v54  ;;  %v2517_v58 = vld [vmem:[#allocation5 + $0x10] ss:$8 sps:$4 sm:$0xff]   ;;  %v3015_v59 = vld [vmem:[%s2849_s16 + $0xa4] ss:$8 sps:$4 sm:$0xff]   ;;  %v3019_v61 = vld [vmem:[#allocation2 + $0xd4] ss:$8 sps:$4 sm:$0xff]  }
  0x4a   : > { %1085 = vmatpush1.bf16.msra.mxu1 %v2514_v55  ;;  %v2522_v62 = vld [vmem:[#allocation5 + $0x4] ss:$8 sps:$4 sm:$0xff]   ;;  %v2524_v63 = vld [vmem:[#allocation5] ss:$8 sps:$4 sm:$0xff]   ;;  %v3031_v2 = vld [vmem:[%s2849_s16 + $0xb4] ss:$8 sps:$4 sm:$0xff]  }
  0x4b   : > { %2189 = vmatpush3.bf16.msra.mxu0 %v2414_v12  ;;  %1086 = vmatprep.subr.bf16.mxu1 %v2515_v56  ;;  %v3026_v0 = vld [vmem:[%s2849_s16 + $0xa0] ss:$8 sps:$4 sm:$0xff]   ;;  %v3033_v3 = vld [vmem:[#allocation2 + $0xd0] ss:$8 sps:$4 sm:$0xff]   ;;  %v3035_v4 = vld [vmem:[#allocation2 + $0xc4] ss:$8 sps:$4 sm:$0xff]  }
  0x4c   : > { %2190 = vmatprep.subr.bf16.mxu0 %v2415_v13  ;;  %v3042_v5 = vld [vmem:[%s2849_s16 + $0xb0] ss:$8 sps:$4 sm:$0xff]   ;;  %v3045_v6 = vld [vmem:[%s2849_s16 + $0xc4] ss:$8 sps:$4 sm:$0xff]   ;;  %v3047_v7 = vld [vmem:[#allocation2 + $0xc0] ss:$8 sps:$4 sm:$0xff]  }
  0x4d   : > { %v3049_v8 = vld [vmem:[#allocation2 + $0xb4] ss:$8 sps:$4 sm:$0xff]   ;;  %v3056_v9 = vld [vmem:[%s2849_s16 + $0xc0] ss:$8 sps:$4 sm:$0xff]   ;;  %v3061_v12 = vld [vmem:[#allocation2 + $0xb0] ss:$8 sps:$4 sm:$0xff]  }
  0x4e   : > { %1087 = vmatpush1.bf16.msra.mxu1 %v2517_v58  ;;  %v3059_v10 = vld [vmem:[%s2849_s16 + $0xd4] ss:$8 sps:$4 sm:$0xff]   ;;  %v3063_v13 = vld [vmem:[#allocation2 + $0xa4] ss:$8 sps:$4 sm:$0xff]   ;;  %v3084_v54 = vld [vmem:[%s2849_s16 + $0xe0] ss:$8 sps:$4 sm:$0xff]  }
  0x4f   : > { %2191 = vmatpush3.bf16.msra.mxu0 %v2416_v14  ;;  %1088 = vmatprep.subr.bf16.mxu1 %v2522_v62  ;;  %v3070_v14 = vld [vmem:[%s2849_s16 + $0xd0] ss:$8 sps:$4 sm:$0xff]   ;;  %3410 = vst [vmem:[#allocation12_spill] sm:$0xff] %v3084_v54  ;;  %v3087_v55 = vld [vmem:[%s2849_s16 + $0xf4] ss:$8 sps:$4 sm:$0xff]   ;;  %s295_s11 = sand.u32 1, %s2660_s19  }
  0x50   : > { %2192 = vmatprep.subr.bf16.mxu0 %v2417_v15  ;;  %v3073_v15 = vld [vmem:[%s2849_s16 + $0xe4] ss:$8 sps:$4 sm:$0xff]   ;;  %3411 = vst [vmem:[#allocation13_spill] sm:$0xff] %v3087_v55  ;;  %v3089_v56 = vld [vmem:[#allocation2 + $0x90] ss:$8 sps:$4 sm:$0xff]   ;;  %s3346_s21 = scalar_lea.sflag [#allocation4], %s295_s11 }
  0x51   : > { %3409 = vst [vmem:[#allocation11_spill] sm:$0xff] %v3073_v15  ;;  %v3091_v58 = vld [vmem:[#allocation2 + $0x84] ss:$8 sps:$4 sm:$0xff]   ;;  %v3098_v62 = vld [vmem:[%s2849_s16 + $0xf0] ss:$8 sps:$4 sm:$0xff]   ;;  %s1981_s16 = sshll.u32 %s295_s11, 8 }
  0x52   : > { %1089 = vmatpush1.bf16.msra.mxu1 %v2524_v63  ;;  %3412 = vst [vmem:[#allocation14_spill] sm:$0xff] %v3098_v62  ;;  %v3100_v63 = vld [vmem:[#allocation2 + $0x80] ss:$8 sps:$4 sm:$0xff]   ;;  %s3216_s29 = scalar_lea.vmem [#allocation7], %s1981_s16  ;;  %s2596_s8 = sshll.u32 %s2683_s15, 4  ;;  %s2597_s8 = int_to_ptr.vmem [resolvable:$false] %s2596_s8 }
  0x53   : > { %2193 = vmatpush3.bf16.msra.mxu0 %v2418_v16  ;;  %2290 = vmatprep.subr.bf16.mxu1 %v2879_v18  ;;  %v3075_v16 = vld [vmem:[#allocation2 + $0xa0] ss:$8 sps:$4 sm:$0xff]   ;;  %s1861_s10 = sshll.u32 %s3216_s29, 4  ;;  %s2598_s17 = scalar_lea.vmem %s2597_s8, 8192  ;;  %s3341_s10 = int_to_ptr.vmem [resolvable:$true] %s1861_s10 }
  0x54   : > { %1427 = vmatprep.subr.bf16.mxu0 %v2879_v18  ;;  %v3077_v18 = vld [vmem:[#allocation2 + $0x94] ss:$8 sps:$4 sm:$0xff]   ;;  %s2592_s14 = scalar_lea.vmem %s3341_s10, 4096  ;;  %p2599_p0 = scmp.lt.s32.totalorder %s3341_s10, %s2597_s8 }
  0x55   : > { %p2593_p8 = scmp.ne.s32.totalorder %s3341_s10, %s2592_s14  ;;  %p2600_p6 = scmp.lt.s32.totalorder %s2598_s17, %s2592_s14 }
  0x56   : > { %701 = vmatmul.mubr.bf16.vlgmr.msra.gmra.mxu0 %v2877_v17 }
  0x57   : > { %708 = vmatprep.mubr.bf16.mxu0 %v2882_v19  ;;  %1428 = vmatpush1.bf16.xpose.msra.mxu0 %v2884_v20  ;;  %p2594_p11 = pnand %p2593_p8, %p3418_p10  ;;  %p2601_p7 = por %p2600_p6, %p2599_p0 }
  0x58   : > { %1429 = vmatprep.subr.bf16.mxu0 %v2887_v21 }
  0x59   : > { %p2595_p13 = pneg %p2594_p11 }
  0x5b   : > { %p2602_p9 = pnand %p2601_p7, %p2595_p13 }
  0x5e   : > { %709 = vmatmul.mubr.bf16.gmra.mxu0 %v2894_v22 }
  0x5f   : > { %716 = vmatprep.mubr.bf16.mxu0 %v2897_v23  ;;  %1430 = vmatpush1.bf16.xpose.msra.mxu0 %v2899_v24 }
  0x60   : > { %1431 = vmatprep.subr.bf16.mxu0 %v2901_v25 }
  0x66   : > { %717 = vmatmul.mubr.bf16.gmra.mxu0 %v2908_v26 }
  0x67   : > { %724 = vmatprep.mubr.bf16.mxu0 %v2911_v27  ;;  %1432 = vmatpush1.bf16.xpose.msra.mxu0 %v2913_v28 }
  0x68   : > { %1433 = vmatprep.subr.bf16.mxu0 %v2915_v29 }
  0x6e   : > { %725 = vmatmul.mubr.bf16.gmra.mxu0 %v2922_v30 }
  0x6f   : > { %732 = vmatprep.mubr.bf16.mxu0 %v2926_v31  ;;  %1434 = vmatpush1.bf16.xpose.msra.mxu0 %v2928_v32 }
  0x70   : > { %1435 = vmatprep.subr.bf16.mxu0 %v2930_v33 }
  0x76   : > { %733 = vmatmul.mubr.bf16.gmra.mxu0 %v2941_v34 }
  0x77   : > { %740 = vmatprep.mubr.bf16.mxu0 %v2945_v35  ;;  %1436 = vmatpush1.bf16.xpose.msra.mxu0 %v2947_v36 }
  0x78   : > { %1437 = vmatprep.subr.bf16.mxu0 %v2949_v37 }
  0x7e   : > { %741 = vmatmul.mubr.bf16.gmra.mxu0 %v2956_v38 }
  0x7f   : > { %748 = vmatprep.mubr.bf16.mxu0 %v2959_v39  ;;  %1438 = vmatpush1.bf16.xpose.msra.mxu0 %v2961_v40 }
  0x80   : > { %1439 = vmatprep.subr.bf16.mxu0 %v2963_v41 }
  0x86   : > { %749 = vmatmul.mubr.bf16.gmra.mxu0 %v2970_v42 }
  0x87   : > { %756 = vmatprep.mubr.bf16.mxu0 %v2973_v43  ;;  %1440 = vmatpush1.bf16.xpose.msra.mxu0 %v2975_v44 }
  0x88   : > { %1441 = vmatprep.subr.bf16.mxu0 %v2977_v45 }
  0x8e   : > { %757 = vmatmul.mubr.bf16.gmra.mxu0 %v2984_v46 }
  0x8f   : > { %764 = vmatprep.mubr.bf16.mxu0 %v2987_v47  ;;  %1442 = vmatpush1.bf16.xpose.msra.mxu0 %v2989_v48 }
  0x90   : > { %1443 = vmatprep.subr.bf16.mxu0 %v2991_v49 }
  0x96   : > { %765 = vmatmul.mubr.bf16.gmra.mxu0 %v2998_v50 }
  0x97   : > { %772 = vmatprep.mubr.bf16.mxu0 %v3001_v51  ;;  %1444 = vmatpush2.bf16.xpose.msra.mxu0 %v3003_v52 }
  0x98   : > { %1445 = vmatprep.subr.bf16.mxu0 %v3005_v53 }
  0x9e   : > { %773 = vmatmul.mubr.bf16.gmra.mxu0 %v3012_v57 }
  0x9f   : > { %780 = vmatprep.mubr.bf16.mxu0 %v3015_v59  ;;  %1446 = vmatpush2.bf16.xpose.msra.mxu0 %v3017_v60 }
  0xa0   : > { %1447 = vmatprep.subr.bf16.mxu0 %v3019_v61 }
  0xa6   : > { %781 = vmatmul.mubr.bf16.gmra.mxu0 %v3026_v0 }
  0xa7   : > { %788 = vmatprep.mubr.bf16.mxu0 %v3031_v2  ;;  %1448 = vmatpush2.bf16.xpose.msra.mxu0 %v3033_v3 }
  0xa8   : > { %1449 = vmatprep.subr.bf16.mxu0 %v3035_v4 }
  0xae   : > { %789 = vmatmul.mubr.bf16.gmra.mxu0 %v3042_v5 }
  0xaf   : > { %796 = vmatprep.mubr.bf16.mxu0 %v3045_v6  ;;  %1450 = vmatpush2.bf16.xpose.msra.mxu0 %v3047_v7 }
  0xb0   : > { %1451 = vmatprep.subr.bf16.mxu0 %v3049_v8 }
  0xb6   : > { %797 = vmatmul.mubr.bf16.gmra.mxu0 %v3056_v9 }
  0xb7   : > { %804 = vmatprep.mubr.bf16.mxu0 %v3059_v10  ;;  %1452 = vmatpush2.bf16.xpose.msra.mxu0 %v3061_v12 }
  0xb8   : > { %1453 = vmatprep.subr.bf16.mxu0 %v3063_v13 }
  0xbe   : > { %805 = vmatmul.mubr.bf16.gmra.mxu0 %v3070_v14 }
  0xbf   : > { %812 = vmatprep.mubr.bf16.mxu0 %v3073_v15  ;;  %1454 = vmatpush2.bf16.xpose.msra.mxu0 %v3075_v16  ;;  %v2525_v15 = vld [vmem:[%s2935_s27 + $0x8] sm:$0xff]  }
  0xc0   : > { %1455 = vmatprep.subr.bf16.mxu0 %v3077_v18 }
  0xc6   : > { %813 = vmatmul.mubr.bf16.gmra.mxu0 %v3084_v54 }
  0xc7   : > { %820 = vmatprep.mubr.bf16.mxu0 %v3087_v55  ;;  %1456 = vmatpush2.bf16.xpose.msra.mxu0 %v3089_v56 }
  0xc8   : > { %1457 = vmatprep.subr.bf16.mxu0 %v3091_v58 }
  0xce   : > { %821 = vmatmul.mubr.bf16.gmra.mxu0 %v3098_v62 }
  0xcf   : > { %1458 = vmatpush2.bf16.xpose.msra.mxu0 %v3100_v63  ;;  %1459 = vmatprep.mubr.bf16.mxu0 %v2858_v11 }
  0xd6   : > { %1460 = vmatmul.mubr.bf16.vlgmr.msra.gmra.mxu0 %v2877_v17 }
  0xd7   : > { %1469 = vmatprep.mubr.bf16.mxu0 %v2882_v19 }
  0xde   : > { %1470 = vmatmul.mubr.bf16.gmra.mxu0 %v2894_v22 }
  0xdf   : > { %1479 = vmatprep.mubr.bf16.mxu0 %v2897_v23 }
  0xe6   : > { %1480 = vmatmul.mubr.bf16.gmra.mxu0 %v2908_v26  ;;  %v2521_v26 = vld [vmem:[%s2935_s27] sm:$0xff]  }
  0xe7   : > { %1489 = vmatprep.mubr.bf16.mxu0 %v2911_v27 }
  0xee   : > { %1490 = vmatmul.mubr.bf16.gmra.mxu0 %v2922_v30 }
  0xef   : > { %1499 = vmatprep.mubr.bf16.mxu0 %v2926_v31 }
  0xf6   : > { %1500 = vmatmul.mubr.bf16.gmra.mxu0 %v2941_v34 }
  0xf7   : > { %1509 = vmatprep.mubr.bf16.mxu0 %v2945_v35  ;;  %v3413_v35 = vmov 0  }
  0xfe   : > { %1510 = vmatmul.mubr.bf16.gmra.mxu0 %v2956_v38 }
 0x116   : > { %v2194_v11 = vpop.f32.mrf.mxu0 }
 0x118   : > { %v2195_v17 = vpop.f32.mrf.mxu0 }
 0x119   : > { %v2196_v23 = vadd.f32 %v2195_v17, %v2194_v11 }
 0x11a   : > { %v2197_v19 = vpop.f32.mrf.mxu0 }
 0x11c   : > { %v2198_v22 = vpop.f32.mrf.mxu0 }
 0x11d   : > { %v2199_v1 = vadd.f32 %v2198_v22, %v2197_v19 }
 0x11e   : > { %v2200_v62 = vpop.f32.mrf.mxu0 }
 0x11f   : > { %v829_v27 = vpack.c.bf16 %v2199_v1, %v2196_v23 }
 0x120   : > { %v2201_v55 = vpop.f32.mrf.mxu0 }
 0x121   : > { %v973_v30 = vmul.bf16 %v2521_v26, %v829_v27  ;;  %v2202_v38 = vadd.f32 %v2201_v55, %v2200_v62  ;;  %v2526_v55 = vld [vmem:[%s2935_s27 + $0x10] sm:$0xff]  }
 0x122   : > { %v2203_v31 = vpop.f32.mrf.mxu0 }
 0x123   : > { %2057 = vmatmul.mubr.msk.bf16.vlgmr.msra.gmra.mxu1 %vm1025_vm0, %v973_v30 }
 0x124   : > { %2306 = vmatpush1.bf16.xpose.msra.mxu1 %v2884_v20  ;;  %v2204_v34 = vpop.f32.mrf.mxu0  ;;  %1116 = vmatprep.mubr.bf16.mxu1 %v3413_v35 }
 0x125   : > { %v2205_v54 = vadd.f32 %v2204_v34, %v2203_v31  ;;  %2291 = vmatprep.subr.bf16.mxu1 %v2887_v21  ;;  %v2527_v34 = vld [vmem:[%s2935_s27 + $0x18] sm:$0xff]  }
 0x126   : > { %v2206_v11 = vpop.f32.mrf.mxu0 }
 0x127   : > { %v830_v17 = vpack.c.bf16 %v2205_v54, %v2202_v38 }
 0x128   : > { %v2207_v1 = vpop.f32.mrf.mxu0 }
 0x129   : > { %v974_v19 = vmul.bf16 %v2525_v15, %v830_v17  ;;  %v2208_v20 = vadd.f32 %v2207_v1, %v2206_v11 }
 0x12a   : > { %v2209_v22 = vpop.f32.mrf.mxu0 }
 0x12b   : > { %2058 = vmatmul.mubr.msk.bf16.gmra.mxu1 %vm1025_vm0, %v974_v19 }
 0x12c   : > { %2307 = vmatpush1.bf16.xpose.msra.mxu1 %v2899_v24  ;;  %v2210_v23 = vpop.f32.mrf.mxu0  ;;  %1126 = vmatprep.mubr.bf16.mxu1 %v3413_v35 }
 0x12d   : > { %v2211_v26 = vadd.f32 %v2210_v23, %v2209_v22  ;;  %2292 = vmatprep.subr.bf16.mxu1 %v2901_v25  ;;  %v2528_v23 = vld [vmem:[%s2935_s27 + $0x20] sm:$0xff]  }
 0x12e   : > { %v2212_v62 = vpop.f32.mrf.mxu0 }
 0x12f   : > { %v831_v21 = vpack.c.bf16 %v2211_v26, %v2208_v20 }
 0x130   : > { %v2213_v27 = vpop.f32.mrf.mxu0 }
 0x131   : > { %v975_v54 = vmul.bf16 %v2526_v55, %v831_v21  ;;  %v2214_v24 = vadd.f32 %v2213_v27, %v2212_v62 }
 0x132   : > { %v2215_v30 = vpop.f32.mrf.mxu0 }
 0x133   : > { %2059 = vmatmul.mubr.msk.bf16.gmra.mxu1 %vm1025_vm0, %v975_v54  ;;  %v2529_v54 = vld [vmem:[%s2935_s27 + $0x28] sm:$0xff]  }
 0x134   : > { %2308 = vmatpush1.bf16.xpose.msra.mxu1 %v2913_v28  ;;  %v2216_v15 = vpop.f32.mrf.mxu0  ;;  %1136 = vmatprep.mubr.bf16.mxu1 %v3413_v35 }
 0x135   : > { %v2217_v31 = vadd.f32 %v2216_v15, %v2215_v30  ;;  %2293 = vmatprep.subr.bf16.mxu1 %v2915_v29 }
 0x136   : > { %v2218_v38 = vpop.f32.mrf.mxu0 }
 0x137   : > { %v832_v25 = vpack.c.bf16 %v2217_v31, %v2214_v24 }
 0x138   : > { %v2219_v11 = vpop.f32.mrf.mxu0 }
 0x139   : > { %v976_v17 = vmul.bf16 %v2527_v34, %v832_v25  ;;  %v2220_v28 = vadd.f32 %v2219_v11, %v2218_v38  ;;  %v2530_v25 = vld [vmem:[%s2935_s27 + $0x30] sm:$0xff]  }
 0x13a   : > { %v2221_v1 = vpop.f32.mrf.mxu0 }
 0x13b   : > { %2060 = vmatmul.mubr.msk.bf16.gmra.mxu1 %vm1025_vm0, %v976_v17 }
 0x13c   : > { %2309 = vmatpush1.bf16.xpose.msra.mxu1 %v2928_v32  ;;  %v2222_v19 = vpop.f32.mrf.mxu0  ;;  %1146 = vmatprep.mubr.bf16.mxu1 %v3413_v35 }
 0x13d   : > { %v2223_v22 = vadd.f32 %v2222_v19, %v2221_v1  ;;  %2294 = vmatprep.subr.bf16.mxu1 %v2930_v33 }
 0x13e   : > { %v2224_v20 = vpop.f32.mrf.mxu0 }
 0x13f   : > { %v833_v29 = vpack.c.bf16 %v2223_v22, %v2220_v28 }
 0x140   : > { %v2225_v26 = vpop.f32.mrf.mxu0 }
 0x141   : > { %v977_v55 = vmul.bf16 %v2528_v23, %v833_v29  ;;  %v2226_v32 = vadd.f32 %v2225_v26, %v2224_v20  ;;  %v2531_v23 = vld [vmem:[%s2935_s27 + $0x38] sm:$0xff]  }
 0x142   : > { %v2227_v62 = vpop.f32.mrf.mxu0 }
 0x143   : > { %2061 = vmatmul.mubr.msk.bf16.gmra.mxu1 %vm1025_vm0, %v977_v55 }
 0x144   : > { %2310 = vmatpush1.bf16.xpose.msra.mxu1 %v2947_v36  ;;  %v2228_v21 = vpop.f32.mrf.mxu0  ;;  %1156 = vmatprep.mubr.bf16.mxu1 %v3413_v35 }
 0x145   : > { %v2229_v27 = vadd.f32 %v2228_v21, %v2227_v62  ;;  %2295 = vmatprep.subr.bf16.mxu1 %v2949_v37 }
 0x146   : > { %v2230_v30 = vpop.f32.mrf.mxu0 }
 0x147   : > { %v834_v33 = vpack.c.bf16 %v2229_v27, %v2226_v32  ;;  %v2532_v32 = vld [vmem:[%s2935_s27 + $0x40] sm:$0xff]  }
 0x148   : > { %v2231_v15 = vpop.f32.mrf.mxu0 }
 0x149   : > { %v978_v24 = vmul.bf16 %v2529_v54, %v834_v33  ;;  %v2232_v36 = vadd.f32 %v2231_v15, %v2230_v30 }
 0x14a   : > { %v2233_v31 = vpop.f32.mrf.mxu0 }
 0x14b   : > { %2062 = vmatmul.mubr.msk.bf16.gmra.mxu1 %vm1025_vm0, %v978_v24 }
 0x14c   : > { %2311 = vmatpush1.bf16.xpose.msra.mxu1 %v2961_v40  ;;  %v2234_v34 = vpop.f32.mrf.mxu0  ;;  %1166 = vmatprep.mubr.bf16.mxu1 %v3413_v35 }
 0x14d   : > { %v2235_v38 = vadd.f32 %v2234_v34, %v2233_v31  ;;  %2296 = vmatprep.subr.bf16.mxu1 %v2963_v41  ;;  %v2533_v31 = vld [vmem:[%s2935_s27 + $0x48] sm:$0xff]  }
 0x14e   : > { %v2236_v11 = vpop.f32.mrf.mxu0 }
 0x14f   : > { %v835_v37 = vpack.c.bf16 %v2235_v38, %v2232_v36 }
 0x150   : > { %v2237_v17 = vpop.f32.mrf.mxu0 }
 0x151   : > { %v979_v1 = vmul.bf16 %v2530_v25, %v835_v37  ;;  %v2238_v40 = vadd.f32 %v2237_v17, %v2236_v11  ;;  %v2534_v17 = vld [vmem:[%s2935_s27 + $0x50] sm:$0xff]  }
 0x152   : > { %v2239_v19 = vpop.f32.mrf.mxu0 }
 0x153   : > { %2063 = vmatmul.mubr.msk.bf16.gmra.mxu1 %vm1025_vm0, %v979_v1 }
 0x154   : > { %2312 = vmatpush1.bf16.xpose.msra.mxu1 %v2975_v44  ;;  %v2240_v28 = vpop.f32.mrf.mxu0  ;;  %1176 = vmatprep.mubr.bf16.mxu1 %v3413_v35 }
 0x155   : > { %v2241_v22 = vadd.f32 %v2240_v28, %v2239_v19  ;;  %2297 = vmatprep.subr.bf16.mxu1 %v2977_v45 }
 0x156   : > { %v2242_v20 = vpop.f32.mrf.mxu0 }
 0x157   : > { %v836_v41 = vpack.c.bf16 %v2241_v22, %v2238_v40 }
 0x158   : > { %v2243_v29 = vpop.f32.mrf.mxu0 }
 0x159   : > { %v980_v26 = vmul.bf16 %v2531_v23, %v836_v41  ;;  %v2244_v44 = vadd.f32 %v2243_v29, %v2242_v20  ;;  %v2535_v20 = vld [vmem:[%s2935_s27 + $0x58] sm:$0xff]  }
 0x15a   : > { %v2245_v55 = vpop.f32.mrf.mxu0 }
 0x15b   : > { %2064 = vmatmul.mubr.msk.bf16.gmra.mxu1 %vm1025_vm0, %v980_v26 }
 0x15c   : > { %2313 = vmatpush1.bf16.xpose.msra.mxu1 %v2989_v48  ;;  %v2246_v62 = vpop.f32.mrf.mxu0  ;;  %1186 = vmatprep.mubr.bf16.mxu1 %v3413_v35 }
 0x15d   : > { %v2247_v21 = vadd.f32 %v2246_v62, %v2245_v55  ;;  %2298 = vmatprep.subr.bf16.mxu1 %v2991_v49 }
 0x15e   : > { %v2248_v27 = vpop.f32.mrf.mxu0 }
 0x15f   : > { %v837_v45 = vpack.c.bf16 %v2247_v21, %v2244_v44  ;;  %v2536_v21 = vld [vmem:[%s2935_s27 + $0x60] sm:$0xff]  }
 0x160   : > { %v2249_v54 = vpop.f32.mrf.mxu0 }
 0x161   : > { %v981_v30 = vmul.bf16 %v2532_v32, %v837_v45  ;;  %v2250_v48 = vadd.f32 %v2249_v54, %v2248_v27 }
 0x162   : > { %v2251_v33 = vpop.f32.mrf.mxu0 }
 0x163   : > { %2065 = vmatmul.mubr.msk.bf16.gmra.mxu1 %vm1025_vm0, %v981_v30 }
 0x164   : > { %2314 = vmatpush2.bf16.xpose.msra.mxu1 %v3003_v52  ;;  %v2252_v15 = vpop.f32.mrf.mxu0  ;;  %1196 = vmatprep.mubr.bf16.mxu1 %v3413_v35 }
 0x165   : > { %v2253_v24 = vadd.f32 %v2252_v15, %v2251_v33  ;;  %2299 = vmatprep.subr.bf16.mxu1 %v3005_v53  ;;  %v2537_v15 = vld [vmem:[%s2935_s27 + $0x68] sm:$0xff]  }
 0x166   : > { %v2254_v34 = vpop.f32.mrf.mxu0 }
 0x167   : > { %v838_v49 = vpack.c.bf16 %v2253_v24, %v2250_v48 }
 0x168   : > { %v2255_v36 = vpop.f32.mrf.mxu0 }
 0x169   : > { %v982_v38 = vmul.bf16 %v2533_v31, %v838_v49  ;;  %v2256_v52 = vadd.f32 %v2255_v36, %v2254_v34 }
 0x16a   : > { %v2257_v25 = vpop.f32.mrf.mxu0 }
 0x16b   : > { %2066 = vmatmul.mubr.msk.bf16.gmra.mxu1 %vm1025_vm0, %v982_v38  ;;  %v2538_v38 = vld [vmem:[%s2935_s27 + $0x70] sm:$0xff]  }
 0x16c   : > { %2315 = vmatpush2.bf16.xpose.msra.mxu1 %v3017_v60  ;;  %v2258_v11 = vpop.f32.mrf.mxu0  ;;  %1206 = vmatprep.mubr.bf16.mxu1 %v3413_v35 }
 0x16d   : > { %v2259_v37 = vadd.f32 %v2258_v11, %v2257_v25  ;;  %2300 = vmatprep.subr.bf16.mxu1 %v3019_v61 }
 0x16e   : > { %v2260_v1 = vpop.f32.mrf.mxu0 }
 0x16f   : > { %v839_v53 = vpack.c.bf16 %v2259_v37, %v2256_v52 }
 0x170   : > { %v2261_v19 = vpop.f32.mrf.mxu0 }
 0x171   : > { %v983_v28 = vmul.bf16 %v2534_v17, %v839_v53  ;;  %v2262_v60 = vadd.f32 %v2261_v19, %v2260_v1  ;;  %v2539_v53 = vld [vmem:[%s2935_s27 + $0x78] sm:$0xff]  }
 0x172   : > { %v2263_v40 = vpop.f32.mrf.mxu0 }
 0x173   : > { %2067 = vmatmul.mubr.msk.bf16.gmra.mxu1 %vm1025_vm0, %v983_v28 }
 0x174   : > { %2316 = vmatpush2.bf16.xpose.msra.mxu1 %v3033_v3  ;;  %v2264_v22 = vpop.f32.mrf.mxu0  ;;  %1216 = vmatprep.mubr.bf16.mxu1 %v3413_v35 }
 0x175   : > { %v2265_v23 = vadd.f32 %v2264_v22, %v2263_v40  ;;  %2301 = vmatprep.subr.bf16.mxu1 %v3035_v4 }
 0x176   : > { %v2266_v41 = vpop.f32.mrf.mxu0 }
 0x177   : > { %v840_v61 = vpack.c.bf16 %v2265_v23, %v2262_v60 }
 0x178   : > { %v2267_v29 = vpop.f32.mrf.mxu0 }
 0x179   : > { %v984_v26 = vmul.bf16 %v2535_v20, %v840_v61  ;;  %v2268_v3 = vadd.f32 %v2267_v29, %v2266_v41  ;;  %v3417_v61 = vld [vmem:[#allocation14_spill] sm:$0xff] }
 0x17a   : > { %v2269_v55 = vpop.f32.mrf.mxu0 }
 0x17b   : > { %2068 = vmatmul.mubr.msk.bf16.gmra.mxu1 %vm1025_vm0, %v984_v26 }
 0x17c   : > { %2317 = vmatpush2.bf16.xpose.msra.mxu1 %v3047_v7  ;;  %v2270_v62 = vpop.f32.mrf.mxu0  ;;  %1226 = vmatprep.mubr.bf16.mxu1 %v3413_v35 }
 0x17d   : > { %v2271_v44 = vadd.f32 %v2270_v62, %v2269_v55  ;;  %2302 = vmatprep.subr.bf16.mxu1 %v3049_v8 }
 0x17e   : > { %v2272_v32 = vpop.f32.mrf.mxu0 }
 0x17f   : > { %v841_v4 = vpack.c.bf16 %v2271_v44, %v2268_v3 }
 0x180   : > { %v2273_v27 = vpop.f32.mrf.mxu0 }
 0x181   : > { %v985_v45 = vmul.bf16 %v2536_v21, %v841_v4  ;;  %v2274_v7 = vadd.f32 %v2273_v27, %v2272_v32 }
 0x182   : > { %v2275_v54 = vpop.f32.mrf.mxu0 }
 0x183   : > { %2069 = vmatmul.mubr.msk.bf16.gmra.mxu1 %vm1025_vm0, %v985_v45 }
 0x184   : > { %2318 = vmatpush2.bf16.xpose.msra.mxu1 %v3061_v12  ;;  %v2276_v30 = vpop.f32.mrf.mxu0  ;;  %1236 = vmatprep.mubr.bf16.mxu1 %v3413_v35 }
 0x185   : > { %v2277_v33 = vadd.f32 %v2276_v30, %v2275_v54  ;;  %2303 = vmatprep.subr.bf16.mxu1 %v3063_v13 }
 0x186   : > { %v2278_v48 = vpop.f32.mrf.mxu0 }
 0x187   : > { %v842_v8 = vpack.c.bf16 %v2277_v33, %v2274_v7 }
 0x188   : > { %v2279_v24 = vpop.f32.mrf.mxu0 }
 0x189   : > { %v986_v31 = vmul.bf16 %v2537_v15, %v842_v8  ;;  %v2280_v12 = vadd.f32 %v2279_v24, %v2278_v48 }
 0x18a   : > { %v2281_v34 = vpop.f32.mrf.mxu0 }
 0x18b   : > { %2070 = vmatmul.mubr.msk.bf16.gmra.mxu1 %vm1025_vm0, %v986_v31 }
 0x18c   : > { %2319 = vmatpush2.bf16.xpose.msra.mxu1 %v3075_v16  ;;  %v2282_v49 = vpop.f32.mrf.mxu0  ;;  %1246 = vmatprep.mubr.bf16.mxu1 %v3413_v35 }
 0x18d   : > { %v2283_v36 = vadd.f32 %v2282_v49, %v2281_v34  ;;  %2304 = vmatprep.subr.bf16.mxu1 %v3077_v18 }
 0x18e   : > { %v2284_v25 = vpop.f32.mrf.mxu0 }
 0x18f   : > { %v843_v13 = vpack.c.bf16 %v2283_v36, %v2280_v12 }
 0x190   : > { %v2285_v11 = vpop.f32.mrf.mxu0 }
 0x191   : > { %v987_v52 = vmul.bf16 %v2538_v38, %v843_v13  ;;  %v2286_v16 = vadd.f32 %v2285_v11, %v2284_v25 }
 0x192   : > { %v2287_v37 = vpop.f32.mrf.mxu0 }
 0x193   : > { %2071 = vmatmul.mubr.msk.bf16.gmra.mxu1 %vm1025_vm0, %v987_v52 }
 0x194   : > { %2320 = vmatpush2.bf16.xpose.msra.mxu1 %v3089_v56  ;;  %v2288_v17 = vpop.f32.mrf.mxu0  ;;  %1256 = vmatprep.mubr.bf16.mxu1 %v3413_v35 }
 0x195   : > { %v2289_v1 = vadd.f32 %v2288_v17, %v2287_v37  ;;  %2305 = vmatprep.subr.bf16.mxu1 %v3091_v58 }
 0x196   : > { %v1461_v18 = vpop.f32.mrf.mxu0 }
 0x197   : > { %v844_v19 = vpack.c.bf16 %v2289_v1, %v2286_v16 }
 0x198   : > { %v1463_v56 = vpop.f32.mrf.mxu0 }
 0x199   : > { %v988_v28 = vmul.bf16 %v2539_v53, %v844_v19 }
 0x19a   : > { %v1465_v58 = vpop.f32.mrf.mxu0 }
 0x19b   : > { %2072 = vmatmul.mubr.msk.bf16.gmra.mxu1 %vm1025_vm0, %v988_v28 }
 0x19c   : > { %2321 = vmatpush2.bf16.xpose.msra.mxu1 %v3100_v63  ;;  %1519 = vmatprep.mubr.bf16.mxu1 %v2959_v39  ;;  %v1467_v39 = vpop.f32.mrf.mxu0 }
 0x1a3   : > { %1520 = vmatmul.mubr.bf16.vlgmr.msra.gmra.mxu1 %v2970_v42  ;;  %v1471_v42 = vpop.f32.mrf.mxu0 }
 0x1a4   : > { %1529 = vmatprep.mubr.bf16.mxu1 %v2973_v43 }
 0x1a5   : > { %v1473_v43 = vpop.f32.mrf.mxu0 }
 0x1ab   : > { %1530 = vmatmul.mubr.bf16.gmra.mxu1 %v2984_v46  ;;  %v1475_v46 = vpop.f32.mrf.mxu0 }
 0x1ac   : > { %1539 = vmatprep.mubr.bf16.mxu1 %v2987_v47 }
 0x1ad   : > { %v1477_v47 = vpop.f32.mrf.mxu0 }
 0x1b3   : > { %1540 = vmatmul.mubr.bf16.gmra.mxu1 %v2998_v50  ;;  %v1481_v50 = vpop.f32.mrf.mxu0 }
 0x1b4   : > { %1549 = vmatprep.mubr.bf16.mxu1 %v3001_v51 }
 0x1b5   : > { %v1483_v51 = vpop.f32.mrf.mxu0 }
 0x1bb   : > { %1550 = vmatmul.mubr.bf16.gmra.mxu1 %v3012_v57  ;;  %v1485_v57 = vpop.f32.mrf.mxu0 }
 0x1bc   : > { %1559 = vmatprep.mubr.bf16.mxu1 %v3015_v59  ;;  %v3414_v59 = vld [vmem:[#allocation11_spill] sm:$0xff] }
 0x1c3   : > { %1560 = vmatmul.mubr.bf16.gmra.mxu1 %v3026_v0  ;;  %v1487_v0 = vpop.f32.mrf.mxu0 }
 0x1c4   : > { %1569 = vmatprep.mubr.bf16.mxu1 %v3031_v2 }
 0x1c5   : > { %v1491_v63 = vpop.f32.mrf.mxu0 }
 0x1c7   : > { %v1493_v22 = vpop.f32.mrf.mxu0 }
 0x1c9   : > { %v1495_v29 = vpop.f32.mrf.mxu0 }
 0x1cb   : > { %1570 = vmatmul.mubr.bf16.gmra.mxu1 %v3042_v5  ;;  %v3415_v5 = vld [vmem:[#allocation12_spill] sm:$0xff]  ;;  %v1497_v21 = vpop.f32.mrf.mxu0 }
 0x1cc   : > { %1579 = vmatprep.mubr.bf16.mxu1 %v3045_v6  ;;  %v3416_v6 = vld [vmem:[#allocation13_spill] sm:$0xff] }
 0x1cd   : > { %v1501_v30 = vpop.f32.mrf.mxu0 }
 0x1cf   : > { %v1503_v24 = vpop.f32.mrf.mxu0 }
 0x1d1   : > { %v1505_v38 = vpop.f32.mrf.mxu0 }
 0x1d3   : > { %1580 = vmatmul.mubr.bf16.gmra.mxu1 %v3056_v9  ;;  %v1507_v17 = vpop.f32.mrf.mxu0 }
 0x1d4   : > { %1589 = vmatprep.mubr.bf16.mxu1 %v3059_v10 }
 0x1db   : > { %1590 = vmatmul.mubr.bf16.gmra.mxu1 %v3070_v14 }
 0x1dc   : > { %1599 = vmatprep.mubr.bf16.mxu1 %v3414_v59 }
 0x1e3   : > { %v1108_v2 = vpop.f32.mrf.mxu1  ;;  %1600 = vmatmul.mubr.bf16.gmra.mxu1 %v3415_v5 }
 0x1e4   : > { %1609 = vmatprep.mubr.bf16.mxu1 %v3416_v6  ;;  %v1462_v35 = vadd.f32 %v1461_v18, %v1108_v2  ;;  %v1511_v18 = vpop.f32.mrf.mxu0 }
 0x1e5   : > { %v1110_v9 = vpop.f32.mrf.mxu1 }
 0x1e6   : > { %v1464_v40 = vadd.f32 %v1463_v56, %v1110_v9 }
 0x1e7   : > { %v1112_v10 = vpop.f32.mrf.mxu1 }
 0x1e8   : > { %v2144_v60 = vpack.c.bf16 %v1464_v40, %v1462_v35  ;;  %v1466_v23 = vadd.f32 %v1465_v58, %v1112_v10 }
 0x1e9   : > { %v1114_v14 = vpop.f32.mrf.mxu1 }
 0x1ea   : > { %1812 = vst [vmem:[%s3216_s29] sm:$0xff] %v2144_v60  ;;  %v1468_v20 = vadd.f32 %v1467_v39, %v1114_v14 }
 0x1eb   : > { %v1118_v41 = vpop.f32.mrf.mxu1  ;;  %1610 = vmatmul.mubr.bf16.gmra.mxu1 %v3417_v61 }
 0x1ec   : > { %v2145_v26 = vpack.c.bf16 %v1468_v20, %v1466_v23  ;;  %v1472_v62 = vadd.f32 %v1471_v42, %v1118_v41 }
 0x1ed   : > { %v1120_v55 = vpop.f32.mrf.mxu1 }
 0x1ee   : > { %1813 = vst [vmem:[%s3216_s29 + $0x8] sm:$0xff] %v2145_v26  ;;  %v1474_v3 = vadd.f32 %v1473_v43, %v1120_v55 }
 0x1ef   : > { %v1122_v44 = vpop.f32.mrf.mxu1 }
 0x1f0   : > { %v2146_v32 = vpack.c.bf16 %v1474_v3, %v1472_v62  ;;  %v1476_v27 = vadd.f32 %v1475_v46, %v1122_v44  ;;  %v1513_v46 = vpop.f32.mrf.mxu0 }
 0x1f1   : > { %v1124_v4 = vpop.f32.mrf.mxu1 }
 0x1f2   : > { %1814 = vst [vmem:[%s3216_s29 + $0x10] sm:$0xff] %v2146_v32  ;;  %v1478_v45 = vadd.f32 %v1477_v47, %v1124_v4 }
 0x1f3   : > { %v1128_v54 = vpop.f32.mrf.mxu1 }
 0x1f4   : > { %v2147_v7 = vpack.c.bf16 %v1478_v45, %v1476_v27  ;;  %v1482_v15 = vadd.f32 %v1481_v50, %v1128_v54 }
 0x1f5   : > { %v1130_v33 = vpop.f32.mrf.mxu1 }
 0x1f6   : > { %1815 = vst [vmem:[%s3216_s29 + $0x18] sm:$0xff] %v2147_v7  ;;  %v1484_v48 = vadd.f32 %v1483_v51, %v1130_v33 }
 0x1f7   : > { %v1132_v8 = vpop.f32.mrf.mxu1 }
 0x1f8   : > { %v2148_v31 = vpack.c.bf16 %v1484_v48, %v1482_v15  ;;  %v1486_v49 = vadd.f32 %v1485_v57, %v1132_v8 }
 0x1f9   : > { %v1134_v34 = vpop.f32.mrf.mxu1 }
 0x1fa   : > { %1816 = vst [vmem:[%s3216_s29 + $0x20] sm:$0xff] %v2148_v31  ;;  %v1488_v12 = vadd.f32 %v1487_v0, %v1134_v34  ;;  %v1515_v0 = vpop.f32.mrf.mxu0 }
 0x1fb   : > { %v1138_v36 = vpop.f32.mrf.mxu1 }
 0x1fc   : > { %v2149_v25 = vpack.c.bf16 %v1488_v12, %v1486_v49  ;;  %v1492_v11 = vadd.f32 %v1491_v63, %v1138_v36  ;;  %v1517_v35 = vpop.f32.mrf.mxu0 }
 0x1fd   : > { %v1140_v13 = vpop.f32.mrf.mxu1 }
 0x1fe   : > { %1817 = vst [vmem:[%s3216_s29 + $0x28] sm:$0xff] %v2149_v25  ;;  %v1494_v52 = vadd.f32 %v1493_v22, %v1140_v13 }
 0x1ff   : > { %v1142_v37 = vpop.f32.mrf.mxu1 }
 0x200   : > { %v2150_v16 = vpack.c.bf16 %v1494_v52, %v1492_v11  ;;  %v1496_v53 = vadd.f32 %v1495_v29, %v1142_v37 }
 0x201   : > { %v1144_v1 = vpop.f32.mrf.mxu1 }
 0x202   : > { %1818 = vst [vmem:[%s3216_s29 + $0x30] sm:$0xff] %v2150_v16  ;;  %v1498_v19 = vadd.f32 %v1497_v21, %v1144_v1 }
 0x203   : > { %v1148_v28 = vpop.f32.mrf.mxu1 }
 0x204   : > { %v2151_v56 = vpack.c.bf16 %v1498_v19, %v1496_v53  ;;  %v1502_v39 = vadd.f32 %v1501_v30, %v1148_v28 }
 0x205   : > { %v1150_v58 = vpop.f32.mrf.mxu1 }
 0x206   : > { %1819 = vst [vmem:[%s3216_s29 + $0x38] sm:$0xff] %v2151_v56  ;;  %v1504_v42 = vadd.f32 %v1503_v24, %v1150_v58 }
 0x207   : > { %v1152_v43 = vpop.f32.mrf.mxu1 }
 0x208   : > { %v2152_v47 = vpack.c.bf16 %v1504_v42, %v1502_v39  ;;  %v1506_v51 = vadd.f32 %v1505_v38, %v1152_v43 }
 0x209   : > { %v1154_v50 = vpop.f32.mrf.mxu1 }
 0x20a   : > { %1820 = vst [vmem:[%s3216_s29 + $0x40] sm:$0xff] %v2152_v47  ;;  %v1508_v57 = vadd.f32 %v1507_v17, %v1154_v50 }
 0x20b   : > { %v1158_v59 = vpop.f32.mrf.mxu1 }
 0x20c   : > { %v2153_v2 = vpack.c.bf16 %v1508_v57, %v1506_v51  ;;  %v1512_v63 = vadd.f32 %v1511_v18, %v1158_v59 }
 0x20d   : > { %v1160_v5 = vpop.f32.mrf.mxu1 }
 0x20e   : > { %1821 = vst [vmem:[%s3216_s29 + $0x48] sm:$0xff] %v2153_v2  ;;  %v1514_v6 = vadd.f32 %v1513_v46, %v1160_v5 }
 0x20f   : > { %v1162_v9 = vpop.f32.mrf.mxu1 }
 0x210   : > { %v2154_v40 = vpack.c.bf16 %v1514_v6, %v1512_v63  ;;  %v1516_v22 = vadd.f32 %v1515_v0, %v1162_v9 }
 0x211   : > { %v1164_v10 = vpop.f32.mrf.mxu1 }
 0x212   : > { %1822 = vst [vmem:[%s3216_s29 + $0x50] sm:$0xff] %v2154_v40  ;;  %v1518_v60 = vadd.f32 %v1517_v35, %v1164_v10 }
 0x213   : > { %v1168_v14 = vpop.f32.mrf.mxu1 }
 0x214   : > { %v2155_v23 = vpack.c.bf16 %v1518_v60, %v1516_v22 }
 0x215   : > { %v1170_v20 = vpop.f32.mrf.mxu1 }
 0x216   : > { %1823 = vst [vmem:[%s3216_s29 + $0x58] sm:$0xff] %v2155_v23 }
 0x217   : > { %v1172_v41 = vpop.f32.mrf.mxu1 }
 0x219   : > { %v1174_v61 = vpop.f32.mrf.mxu1 }
 0x21b   : > { %v1178_v29 = vpop.f32.mrf.mxu1 }
 0x21d   : > { %v1180_v26 = vpop.f32.mrf.mxu1 }
 0x21f   : > { %v1182_v55 = vpop.f32.mrf.mxu1 }
 0x221   : > { %v1184_v62 = vpop.f32.mrf.mxu1 }
 0x223   : > { %v1188_v3 = vpop.f32.mrf.mxu1 }
 0x225   : > { %v1190_v44 = vpop.f32.mrf.mxu1 }
 0x227   : > { %v1192_v21 = vpop.f32.mrf.mxu1 }
 0x229   : > { %v1194_v32 = vpop.f32.mrf.mxu1 }
 0x22b   : > { %v3231_v4 = vpop.f32.mrf.mxu1 }
 0x22d   : > { %v3233_v27 = vpop.f32.mrf.mxu1 }
 0x22f   : > { %v3235_v45 = vpop.f32.mrf.mxu1 }
 0x231   : > { %v3237_v54 = vpop.f32.mrf.mxu1 }
 0x233   : > { %v3239_v30 = vpop.f32.mrf.mxu1 }
 0x235   : > { %v3241_v7 = vpop.f32.mrf.mxu1 }
 0x237   : > { %v3243_v33 = vpop.f32.mrf.mxu1 }
 0x239   : > { %v3245_v15 = vpop.f32.mrf.mxu1 }
 0x23b   : > { %v3247_v48 = vpop.f32.mrf.mxu1 }
 0x23d   : > { %v3249_v8 = vpop.f32.mrf.mxu1 }
 0x23f   : > { %v3251_v24 = vpop.f32.mrf.mxu1 }
 0x241   : > { %v3253_v31 = vpop.f32.mrf.mxu1 }
 0x243   : > { %v3255_v34 = vpop.f32.mrf.mxu1 }
 0x245   : > { %v3257_v49 = vpop.f32.mrf.mxu1 }
 0x247   : > { %v3259_v12 = vpop.f32.mrf.mxu1 }
 0x249   : > { %v3261_v36 = vpop.f32.mrf.mxu1 }
 0x24b   : > { %v3263_v38 = vpop.f32.mrf.mxu1 }
 0x24d   : > { %v3265_v25 = vpop.f32.mrf.mxu1 }
 0x24f   : > { %v3267_v13 = vpop.f32.mrf.mxu1 }
 0x251   : > { %v3269_v11 = vpop.f32.mrf.mxu1 }
 0x253   : > { %v3271_v52 = vpop.f32.mrf.mxu1 }
 0x255   : > { %v3273_v37 = vpop.f32.mrf.mxu1 }
 0x257   : > { %v3275_v17 = vpop.f32.mrf.mxu1 }
 0x259   : > { %v3277_v16 = vpop.f32.mrf.mxu1 }
 0x25b   : > { %v3279_v1 = vpop.f32.mrf.mxu1 }
 0x25d   : > { %v3281_v53 = vpop.f32.mrf.mxu1 }
 0x25f   : > { %v3283_v19 = vpop.f32.mrf.mxu1 }
 0x261   : > { %v3285_v28 = vpop.f32.mrf.mxu1 }
 0x263   : > { %v1521_v18 = vpop.f32.mrf.mxu1 }
 0x264   : > { %v1522_v58 = vadd.f32 %v1521_v18, %v1168_v14 }
 0x265   : > { %v1523_v56 = vpop.f32.mrf.mxu1 }
 0x266   : > { %v1524_v39 = vadd.f32 %v1523_v56, %v1170_v20 }
 0x267   : > { %v1525_v42 = vpop.f32.mrf.mxu1 }
 0x268   : > { %v2156_v43 = vpack.c.bf16 %v1524_v39, %v1522_v58  ;;  %v1526_v47 = vadd.f32 %v1525_v42, %v1172_v41 }
 0x269   : > { %v1527_v46 = vpop.f32.mrf.mxu1 }
 0x26a   : > { %1824 = vst [vmem:[%s3216_s29 + $0x60] sm:$0xff] %v2156_v43  ;;  %v1528_v50 = vadd.f32 %v1527_v46, %v1174_v61 }
 0x26b   : > { %v1531_v51 = vpop.f32.mrf.mxu1 }
 0x26c   : > { %v2157_v57 = vpack.c.bf16 %v1528_v50, %v1526_v47  ;;  %v1532_v0 = vadd.f32 %v1531_v51, %v1178_v29 }
 0x26d   : > { %v1533_v59 = vpop.f32.mrf.mxu1 }
 0x26e   : > { %1825 = vst [vmem:[%s3216_s29 + $0x68] sm:$0xff] %v2157_v57  ;;  %v1534_v2 = vadd.f32 %v1533_v59, %v1180_v26 }
 0x26f   : > { %v1535_v5 = vpop.f32.mrf.mxu1 }
 0x270   : > { %v2158_v63 = vpack.c.bf16 %v1534_v2, %v1532_v0  ;;  %v1536_v9 = vadd.f32 %v1535_v5, %v1182_v55 }
 0x271   : > { %v1537_v6 = vpop.f32.mrf.mxu1 }
 0x272   : > { %1826 = vst [vmem:[%s3216_s29 + $0x70] sm:$0xff] %v2158_v63  ;;  %v1538_v35 = vadd.f32 %v1537_v6, %v1184_v62 }
 0x273   : > { %v1541_v40 = vpop.f32.mrf.mxu1 }
 0x274   : > { %v2159_v10 = vpack.c.bf16 %v1538_v35, %v1536_v9  ;;  %v1542_v60 = vadd.f32 %v1541_v40, %v1188_v3 }
 0x275   : > { %v1543_v22 = vpop.f32.mrf.mxu1 }
 0x276   : > { %1827 = vst [vmem:[%s3216_s29 + $0x78] sm:$0xff] %v2159_v10  ;;  %v1544_v14 = vadd.f32 %v1543_v22, %v1190_v44 }
 0x277   : > { %v1545_v23 = vpop.f32.mrf.mxu1 }
 0x278   : > { %v2160_v20 = vpack.c.bf16 %v1544_v14, %v1542_v60  ;;  %v1546_v61 = vadd.f32 %v1545_v23, %v1192_v21 }
 0x279   : > { %v1547_v41 = vpop.f32.mrf.mxu1 }
 0x27a   : > { %1828 = vst [vmem:[%s3216_s29 + $0x80] sm:$0xff] %v2160_v20  ;;  %v1548_v29 = vadd.f32 %v1547_v41, %v1194_v32 }
 0x27b   : > { %v1551_v26 = vpop.f32.mrf.mxu1 }
 0x27c   : > { %v2161_v18 = vpack.c.bf16 %v1548_v29, %v1546_v61  ;;  %v1552_v55 = vadd.f32 %v1551_v26, %v3231_v4 }
 0x27d   : > { %v1553_v56 = vpop.f32.mrf.mxu1 }
 0x27e   : > { %1829 = vst [vmem:[%s3216_s29 + $0x88] sm:$0xff] %v2161_v18  ;;  %v1554_v62 = vadd.f32 %v1553_v56, %v3233_v27 }
 0x27f   : > { %v1555_v58 = vpop.f32.mrf.mxu1 }
 0x280   : > { %v2162_v3 = vpack.c.bf16 %v1554_v62, %v1552_v55  ;;  %v1556_v39 = vadd.f32 %v1555_v58, %v3235_v45 }
 0x281   : > { %v1557_v44 = vpop.f32.mrf.mxu1 }
 0x282   : > { %1830 = vst [vmem:[%s3216_s29 + $0x90] sm:$0xff] %v2162_v3  ;;  %v1558_v42 = vadd.f32 %v1557_v44, %v3237_v54 }
 0x283   : > { %v1561_v21 = vpop.f32.mrf.mxu1 }
 0x284   : > { %v2163_v32 = vpack.c.bf16 %v1558_v42, %v1556_v39  ;;  %v1562_v46 = vadd.f32 %v1561_v21, %v3239_v30 }
 0x285   : > { %v1563_v43 = vpop.f32.mrf.mxu1 }
 0x286   : > { %1831 = vst [vmem:[%s3216_s29 + $0x98] sm:$0xff] %v2163_v32  ;;  %v1564_v4 = vadd.f32 %v1563_v43, %v3241_v7 }
 0x287   : > { %v1565_v27 = vpop.f32.mrf.mxu1 }
 0x288   : > { %v2164_v47 = vpack.c.bf16 %v1564_v4, %v1562_v46  ;;  %v1566_v51 = vadd.f32 %v1565_v27, %v3243_v33 }
 0x289   : > { %v1567_v50 = vpop.f32.mrf.mxu1 }
 0x28a   : > { %1832 = vst [vmem:[%s3216_s29 + $0xa0] sm:$0xff] %v2164_v47  ;;  %v1568_v45 = vadd.f32 %v1567_v50, %v3245_v15 }
 0x28b   : > { %v1571_v54 = vpop.f32.mrf.mxu1 }
 0x28c   : > { %v2165_v57 = vpack.c.bf16 %v1568_v45, %v1566_v51  ;;  %v1572_v0 = vadd.f32 %v1571_v54, %v3247_v48 }
 0x28d   : > { %v1573_v59 = vpop.f32.mrf.mxu1 }
 0x28e   : > { %1833 = vst [vmem:[%s3216_s29 + $0xa8] sm:$0xff] %v2165_v57  ;;  %v1574_v30 = vadd.f32 %v1573_v59, %v3249_v8 }
 0x28f   : > { %v1575_v7 = vpop.f32.mrf.mxu1 }
 0x290   : > { %v2166_v2 = vpack.c.bf16 %v1574_v30, %v1572_v0  ;;  %v1576_v63 = vadd.f32 %v1575_v7, %v3251_v24 }
 0x291   : > { %v1577_v5 = vpop.f32.mrf.mxu1 }
 0x292   : > { %1834 = vst [vmem:[%s3216_s29 + $0xb0] sm:$0xff] %v2166_v2  ;;  %v1578_v33 = vadd.f32 %v1577_v5, %v3253_v31 }
 0x293   : > { %v1581_v15 = vpop.f32.mrf.mxu1 }
 0x294   : > { %v2167_v6 = vpack.c.bf16 %v1578_v33, %v1576_v63  ;;  %v1582_v35 = vadd.f32 %v1581_v15, %v3255_v34 }
 0x295   : > { %v1583_v9 = vpop.f32.mrf.mxu1 }
 0x296   : > { %1835 = vst [vmem:[%s3216_s29 + $0xb8] sm:$0xff] %v2167_v6  ;;  %v1584_v48 = vadd.f32 %v1583_v9, %v3257_v49 }
 0x297   : > { %v1585_v8 = vpop.f32.mrf.mxu1 }
 0x298   : > { %v2168_v40 = vpack.c.bf16 %v1584_v48, %v1582_v35  ;;  %v1586_v22 = vadd.f32 %v1585_v8, %v3259_v12 }
 0x299   : > { %v1587_v10 = vpop.f32.mrf.mxu1 }
 0x29a   : > { %1836 = vst [vmem:[%s3216_s29 + $0xc0] sm:$0xff] %v2168_v40  ;;  %v1588_v24 = vadd.f32 %v1587_v10, %v3261_v36 }
 0x29b   : > { %v1591_v31 = vpop.f32.mrf.mxu1 }
 0x29c   : > { %v2169_v60 = vpack.c.bf16 %v1588_v24, %v1586_v22  ;;  %v1592_v23 = vadd.f32 %v1591_v31, %v3263_v38 }
 0x29d   : > { %v1593_v14 = vpop.f32.mrf.mxu1 }
 0x29e   : > { %1837 = vst [vmem:[%s3216_s29 + $0xc8] sm:$0xff] %v2169_v60  ;;  %v1594_v34 = vadd.f32 %v1593_v14, %v3265_v25 }
 0x29f   : > { %v1595_v49 = vpop.f32.mrf.mxu1 }
 0x2a0   : > { %v2170_v20 = vpack.c.bf16 %v1594_v34, %v1592_v23  ;;  %v1596_v61 = vadd.f32 %v1595_v49, %v3267_v13 }
 0x2a1   : > { %v1597_v41 = vpop.f32.mrf.mxu1 }
 0x2a2   : > { %1838 = vst [vmem:[%s3216_s29 + $0xd0] sm:$0xff] %v2170_v20  ;;  %v1598_v12 = vadd.f32 %v1597_v41, %v3269_v11 }
 0x2a3   : > { %v1601_v36 = vpop.f32.mrf.mxu1 }
 0x2a4   : > { %v2171_v29 = vpack.c.bf16 %v1598_v12, %v1596_v61  ;;  %v1602_v18 = vadd.f32 %v1601_v36, %v3271_v52 }
 0x2a5   : > { %v1603_v26 = vpop.f32.mrf.mxu1 }
 0x2a6   : > { %1839 = vst [vmem:[%s3216_s29 + $0xd8] sm:$0xff] %v2171_v29  ;;  %v1604_v38 = vadd.f32 %v1603_v26, %v3273_v37 }
 0x2a7   : > { %v1605_v25 = vpop.f32.mrf.mxu1 }
 0x2a8   : > { %v2172_v56 = vpack.c.bf16 %v1604_v38, %v1602_v18  ;;  %v1606_v13 = vadd.f32 %v1605_v25, %v3275_v17 }
 0x2a9   : > { %v1607_v55 = vpop.f32.mrf.mxu1 }
 0x2aa   : > { %1840 = vst [vmem:[%s3216_s29 + $0xe0] sm:$0xff] %v2172_v56  ;;  %v1608_v11 = vadd.f32 %v1607_v55, %v3277_v16 }
 0x2ab   : > { %v1611_v62 = vpop.f32.mrf.mxu1 }
 0x2ac   : > { %v2173_v58 = vpack.c.bf16 %v1608_v11, %v1606_v13  ;;  %v1612_v52 = vadd.f32 %v1611_v62, %v3279_v1 }
 0x2ad   : > { %v1613_v3 = vpop.f32.mrf.mxu1 }
 0x2ae   : > { %1841 = vst [vmem:[%s3216_s29 + $0xe8] sm:$0xff] %v2173_v58  ;;  %v1614_v37 = vadd.f32 %v1613_v3, %v3281_v53 }
 0x2af   : > { %v1615_v44 = vpop.f32.mrf.mxu1 }
 0x2b0   : > { %v2174_v39 = vpack.c.bf16 %v1614_v37, %v1612_v52  ;;  %v1616_v17 = vadd.f32 %v1615_v44, %v3283_v19 }
 0x2b1   : > { %v1617_v42 = vpop.f32.mrf.mxu1 }
 0x2b2   : > { %1842 = vst [vmem:[%s3216_s29 + $0xf0] sm:$0xff] %v2174_v39  ;;  %v1618_v16 = vadd.f32 %v1617_v42, %v3285_v28 }
 0x2b4   : > { %v2175_v1 = vpack.c.bf16 %v1618_v16, %v1616_v17 }
 0x2b6   : > { %1843 = vst [vmem:[%s3216_s29 + $0xf8] sm:$0xff] %v2175_v1 }
 0x2b7   : > { %2605 = shalt.err (!%p2602_p9)
}
 0x2b8   : > { %s2606_s24 = scalar_lea.hbm %s3339_s13, 4096  ;;  %s2610_s11 = scalar_lea.hbm %s3396_s5, 8192 }
 0x2b9   : > { %p2607_p12 = scmp.ne.s32.totalorder %s3339_s13, %s2606_s24  ;;  %p2611_p5 = scmp.lt.s32.totalorder %s3339_s13, %s3396_s5 }
 0x2ba   : > { %p2612_p3 = scmp.lt.s32.totalorder %s2610_s11, %s2606_s24 }
 0x2bb   : > { %p2608_p1 = pnand %p2607_p12, %p3418_p10 }
 0x2bc   : > { %p2613_p4 = por %p2612_p3, %p2611_p5 }
 0x2bd   : > { %p2609_p2 = pneg %p2608_p1 }
 0x2bf   : > { %p2614_p8 = pnand %p2613_p4, %p2609_p2 }
 0x2c1   : > { %2617 = shalt.err (!%p2614_p8)
}
 0x2c2   : > { %s2684_s9 = smov 128   ;;  %s2685_s7 = smov 8  }
 0x2c3   : > { %2330 = dma.vmem_to_hbm [thread:$0]  (%p3418_p10), %s3341_s10, 4096, %s3339_s13, %s3346_s21, %s2684_s9, %s2684_s9, %s2685_s7  }
 0x2c4 PF: > { %p2347_p11 = scmp.ge.s32.totalorder %s2676_s23, 2  ;;  %s1876_s12 = sand.u32 1, %s2656_s18  }
 0x2c5   : > { %p3419_p13 = scmp.ne.s32.totalorder %s3405_s30, 0  ;;  %s1877_s14 = scalar_lea.sflag [#allocation4], %s1876_s12 }
 0x2c7   : > { %p2340_p0 = pnand %p2347_p11, %p3419_p13 }
 0x2c9   : > { %p2341_p6 = pneg %p2340_p0 }
 0x2cb   : > { %2651 = dma.done.wait (%p2341_p6), %s1877_s14, 4096  }
 0x2cc   : > { %2653 = vsyncadd (%p2341_p6), %s1877_s14, 4294963200  ;;  %s20_s23 = sadd.s32 1, %s2676_s23   ;;  %s3420_s18 = smov %s2660_s19 }
 0x2cd   : > { %p17_p7 = scmp.ge.s32.totalorder %s20_s23, 4   ;;  %s3421_s19 = smov %s2664_s20 }
 0x2ce   : > { %s3422_s20 = smov %s2769_s6  ;;  %s3423_s21 = smov %s2672_s22 }
 0x2cf   : > { %s3424_s22 = smov %s3426_s26  ;;  %19 = sbr.rel (!%p17_p7) target bundleno = 6 (0x6), region = 89 }
 0x2d4   :  { %1882 = vsyncpa [#allocation3], 1 }
 0x2d5   :  { %1884 = vsyncpa [#allocation3 + $0x1], 1 }
 0x2d6   :  { %1885 = vsyncpa [#allocation6], 1 }
 0x2d7   :  { %1886 = vsyncpa [#allocation4], 1 }
 0x2d8   :  { %1888 = vsyncpa [#allocation4 + $0x1], 1 }

</bundles_post_ra>
